<compile_context>
chip_gen: v5e
topology: v5e:2x2
jax: 0.10.0
libtpu: 0.0.40
codegen_flags: <defaults>
</compile_context>

<pallas_src>
import functools
import math

import jax
import jax.numpy as jnp
import numpy as np
from jax.experimental import pallas as pl
from jax.experimental.pallas import tpu as pltpu


# ---------------------------------------------------------------------------
# small helpers
# ---------------------------------------------------------------------------
def _round_up(x, m):
    return (x + m - 1) // m * m


def _attn_tiles(n):
    """(n_pad, q_tile, kv_tile).

    Constraints:
      * tq multiple of 16 (bf16 bias block sublane dim) and divides n_pad
      * tk multiple of 128 OR equal to n_pad (full-extent lane dim)
      * >= 2 q-tiles so v7x's two TensorCores both get work
      * n_pad close to round_up(n, 8) -> minimal quadratic padding waste
      * tiles small enough for v5e's 16 MiB default scoped VMEM
    """
    n8 = _round_up(max(int(n), 1), 8)
    if n8 <= 512:
        n_pad = _round_up(n8, 32)
        tq = n_pad // 2          # two q tiles, multiple of 16
        tk = n_pad               # single kv step, full-extent lane dim
    elif n8 <= 2048:
        n_pad = _round_up(n8, 128)
        tq = 128
        tk = n_pad               # full-extent lanes (multiple of 128)
    else:
        n_pad = _round_up(n8, 256)
        tq = 128
        tk = 512 if n_pad % 512 == 0 else 256
    return n_pad, tq, tk


def _edge_paths_to_coo(edge_paths, max_path_distance):
    """{src: {dst: [edge idx, ...]}} -> sparse COO path description (numpy).

    Returns None if there are no (non-empty) paths.  One entry per
    (pair, path-position); empty paths are skipped (torch's nan_to_num -> 0).
    """
    entry_edge, entry_pos, entry_pair = [], [], []
    pair_row, pair_col, pair_inv_len = [], [], []
    for src, dsts in edge_paths.items():
        for dst, path in dsts.items():
            p = list(path)[:max_path_distance]
            if not p:
                continue
            pid = len(pair_row)
            pair_row.append(int(src))
            pair_col.append(int(dst))
            pair_inv_len.append(1.0 / len(p))
            for t, e in enumerate(p):
                entry_edge.append(int(e))
                entry_pos.append(t)
                entry_pair.append(pid)
    if not pair_row:
        return None
    return (np.asarray(entry_edge, np.int32), np.asarray(entry_pos, np.int32),
            np.asarray(entry_pair, np.int32), np.asarray(pair_row, np.int32),
            np.asarray(pair_col, np.int32), np.asarray(pair_inv_len, np.float32))


def _ptr_to_graph_ids(ptr, n, n_pad):
    """Graph id per node; padded nodes get -1 (never equal to a real graph id).
    Assumes ptr (if given) covers [0, n) as a standard PyG batch pointer."""
    gid = np.full((n_pad,), -1, dtype=np.int32)
    if ptr is None:
        gid[:n] = 0
    else:
        pp = [int(t) for t in ptr]
        for g in range(len(pp) - 1):
            gid[pp[g]:pp[g + 1]] = g
    return gid


# ---------------------------------------------------------------------------
# Pallas kernel 1: fused Q/K/V projection (row-tiled, 128-lane-dense output)
# ---------------------------------------------------------------------------
def _proj_kernel(x_ref, w_ref, b_ref, o_ref):
    o_ref[...] = (
        jnp.dot(x_ref[...], w_ref[...], preferred_element_type=jnp.float32)
        + b_ref[...]
    ).astype(o_ref.dtype)


def _fused_qkv(x, w, bias, *, tm):
    """x: (M, Din) with M % tm == 0, w: (Din, Dout_pad), bias: (1, Dout_pad)."""
    m, din = x.shape
    dout = w.shape[1]
    return pl.pallas_call(
        _proj_kernel,
        out_shape=jax.ShapeDtypeStruct((m, dout), jnp.float32),
        grid_spec=pltpu.PrefetchScalarGridSpec(
            num_scalar_prefetch=0,
            grid=(m // tm,),
            in_specs=[
                pl.BlockSpec((tm, din), lambda i: (i, 0)),
                pl.BlockSpec((din, dout), lambda i: (0, 0)),
                pl.BlockSpec((1, dout), lambda i: (0, 0)),
            ],
            out_specs=pl.BlockSpec((tm, dout), lambda i: (i, 0)),
        ),
        compiler_params=pltpu.CompilerParams(dimension_semantics=("parallel",)),
    )(x, w, bias)


# ---------------------------------------------------------------------------
# Pallas kernel 2: fused biased + masked attention (flash-style online softmax)
# ---------------------------------------------------------------------------
def _attn_kernel(n_ref, q_ref, k_ref, v_ref, bias_ref, gr_ref, gc_ref,
                 o_ref, m_sc, l_sc):
    ki = pl.program_id(1)

    @pl.when(ki == 0)
    def _():
        m_sc[...] = jnp.full_like(m_sc, -jnp.inf)
        l_sc[...] = jnp.zeros_like(l_sc)
        o_ref[...] = jnp.zeros_like(o_ref)

    # scores: scale already folded into Wq/bq; contract last dims (no K transpose)
    s = jax.lax.dot_general(q_ref[...], k_ref[...],
                            (((1,), (1,)), ((), ())),
                            preferred_element_type=jnp.float32)      # (TQ, TK)
    s = s + bias_ref[...].astype(jnp.float32)                        # merged b + c

    # batch mask regenerated from per-node graph ids (no (N,N) mask stream)
    same = gr_ref[...] == gc_ref[...]                                # (TQ,1)==(1,TK)
    s = s * jnp.where(same, 1.0, -1.0e6)                             # torch's *mask_neg

    # padded key columns must contribute exactly nothing (no such cols in torch)
    tk = k_ref.shape[0]
    col = ki * tk + jax.lax.broadcasted_iota(jnp.int32, (1, tk), 1)
    col_ok = col < n_ref[0]
    s = jnp.where(col_ok, s, -1.0e30)

    m_prev = m_sc[...]
    m_new = jnp.maximum(m_prev, jnp.max(s, axis=-1, keepdims=True))
    alpha = jnp.exp(m_prev - m_new)
    p = jnp.exp(s - m_new)                                           # unnormalised probs
    # torch normalises over ALL columns, then multiplies by the zeros mask:
    l_sc[...] = alpha * l_sc[...] + jnp.sum(p, axis=-1, keepdims=True)
    pz = jnp.where(same, p, 0.0)                                     # *batch_mask_zeros
    o_ref[...] = alpha * o_ref[...] + jnp.dot(
        pz, v_ref[...], preferred_element_type=jnp.float32)
    m_sc[...] = m_new

    @pl.when(ki == pl.num_programs(1) - 1)
    def _():
        o_ref[...] = o_ref[...] * pl.reciprocal(l_sc[...], approx=True)


def _attention(q, k, v, bias_bf16, gid, n_arr, *, tq, tk):
    n_pad, dq = q.shape
    dk = v.shape[1]
    gid_row = gid.reshape(n_pad, 1)
    gid_col = gid.reshape(1, n_pad)
    return pl.pallas_call(
        _attn_kernel,
        out_shape=jax.ShapeDtypeStruct((n_pad, dk), jnp.float32),
        grid_spec=pltpu.PrefetchScalarGridSpec(
            num_scalar_prefetch=1,                                   # n_valid in SMEM
            grid=(n_pad // tq, n_pad // tk),
            in_specs=[
                pl.BlockSpec((tq, dq), lambda qi, ki, n: (qi, 0)),   # Q
                pl.BlockSpec((tk, dq), lambda qi, ki, n: (ki, 0)),   # K
                pl.BlockSpec((tk, dk), lambda qi, ki, n: (ki, 0)),   # V
                pl.BlockSpec((tq, tk), lambda qi, ki, n: (qi, ki)),  # merged bias (bf16)
                pl.BlockSpec((tq, 1), lambda qi, ki, n: (qi, 0)),    # graph ids (rows)
                pl.BlockSpec((1, tk), lambda qi, ki, n: (0, ki)),    # graph ids (cols)
            ],
            out_specs=pl.BlockSpec((tq, dk), lambda qi, ki, n: (qi, 0)),
            scratch_shapes=[
                pltpu.VMEM((tq, 1), jnp.float32),   # running max
                pltpu.VMEM((tq, 1), jnp.float32),   # running denom
            ],
        ),
        compiler_params=pltpu.CompilerParams(
            dimension_semantics=("parallel", "arbitrary")),
    )(n_arr, q, k, v, bias_bf16, gid_row, gid_col)


# ---------------------------------------------------------------------------
# full forward
# ---------------------------------------------------------------------------
@functools.partial(jax.jit, static_argnames=("n_pad", "tq", "tk", "have_paths"))
def _forward(qx, kx, vx, edge_attr, bias0, paths_coo, gid, n_arr, params,
             *, n_pad, tq, tk, have_paths):
    f32 = jnp.float32
    dq = params["wq"].shape[0]
    dkk = params["wk"].shape[0]
    dvv = params["wv"].shape[0]
    scale = 1.0 / math.sqrt(dq)

    # ---- fused, scale-folded Q/K/V projection (one Pallas call) -----------
    w_cat = jnp.concatenate(
        [params["wq"].astype(f32).T * scale,
         params["wk"].astype(f32).T,
         params["wv"].astype(f32).T], axis=1)                       # (din, dq+dk+dv)
    b_cat = jnp.concatenate(
        [params["bq"].astype(f32) * scale,
         params["bk"].astype(f32),
         params["bv"].astype(f32)])
    dout = w_cat.shape[1]
    dout_pad = _round_up(dout, 128)                                 # lane-dense stores
    w_cat = jnp.pad(w_cat, ((0, 0), (0, dout_pad - dout)))
    b_cat = jnp.pad(b_cat, (0, dout_pad - dout)).reshape(1, dout_pad)
    x_cat = jnp.concatenate([qx, kx, vx], axis=0)                   # (3*n_pad, din)
    qkv = _fused_qkv(x_cat, w_cat, b_cat, tm=tq)                    # (3*n_pad, dout_pad)
    q = qkv[:n_pad, :dq]
    k = qkv[n_pad:2 * n_pad, dq:dq + dkk]
    v = qkv[2 * n_pad:, dq + dkk:dq + dkk + dvv]

    # ---- edge encoding folded into a single merged bias stream ------------
    # TODO(synk): the per-pair scatter-add below has no clean static-BlockSpec
    # Pallas form (data-dependent destinations); it stays in XLA on the sparse
    # COO arrays built host-side (no (N,N,L) dense intermediates anymore).
    bias = bias0
    if have_paths:
        (entry_edge, entry_pos, entry_pair,
         pair_row, pair_col, pair_inv_len) = paths_coo
        ev = params["edge_vector"].astype(f32)                      # (L, edge_dim)
        s_ep = edge_attr.astype(f32) @ ev.T                         # (E, L) tiny XLA GEMM
        vals = s_ep[entry_edge, entry_pos]                          # (#entries,)
        sums = jax.ops.segment_sum(vals, entry_pair,
                                   num_segments=pair_row.shape[0],
                                   indices_are_sorted=True)
        bias = bias.at[pair_row, pair_col].add(sums * pair_inv_len)
    bias = bias.astype(jnp.bfloat16)                                # halve N^2 HBM stream

    return _attention(q, k, v, bias, gid, n_arr, tq=tq, tk=tk)


def graphormer_attention_head(query, key, value, edge_attr, b, edge_paths, ptr, params):
    """Pallas forward of GraphormerAttentionHead.

    query/key/value: (N, dim_in); edge_attr: (E, edge_dim); b: (N, N);
    edge_paths: {src: {dst: [edge index, ...]}} (host Python dict);
    ptr: graph boundary pointers (list/array) or None; params: weight dict.
    """
    # TODO(synk): for multi-head models, batch heads into one attention call
    # (stack V/c along the lane dim) so outputs become >=128 lanes wide.
    n = int(query.shape[0])
    L = int(params["edge_vector"].shape[0])
    n_pad, tq, tk = _attn_tiles(n)
    pad = n_pad - n

    coo = _edge_paths_to_coo(edge_paths, L)
    have_paths = coo is not None
    paths_coo = tuple(jnp.asarray(a) for a in coo) if have_paths else None

    gid = jnp.asarray(_ptr_to_graph_ids(ptr, n, n_pad))
    f32 = jnp.float32
    qx = jnp.pad(jnp.asarray(query, f32), ((0, pad), (0, 0)))
    kx = jnp.pad(jnp.asarray(key, f32), ((0, pad), (0, 0)))
    vx = jnp.pad(jnp.asarray(value, f32), ((0, pad), (0, 0)))
    bias0 = jnp.pad(jnp.asarray(b, f32), ((0, pad), (0, pad)))
    n_arr = jnp.asarray([n], jnp.int32)

    out = _forward(qx, kx, vx, jnp.asarray(edge_attr, f32), bias0, paths_coo,
                   gid, n_arr, params,
                   n_pad=n_pad, tq=tq, tk=tk, have_paths=have_paths)
    return out[:n]


# ---------------------------------------------------------------------------
# plain numpy reference (mirrors the PyTorch forward exactly)
# ---------------------------------------------------------------------------
def _reference_forward(query, key, value, edge_attr, b, edge_paths, ptr, params):
    q = np.asarray(query, np.float32) @ np.asarray(params["wq"]).T + np.asarray(params["bq"])
    k = np.asarray(key, np.float32) @ np.asarray(params["wk"]).T + np.asarray(params["bk"])
    v = np.asarray(value, np.float32) @ np.asarray(params["wv"]).T + np.asarray(params["bv"])
    n = q.shape[0]
    ev = np.asarray(params["edge_vector"], np.float32)
    ea = np.asarray(edge_attr, np.float32)
    L = ev.shape[0]

    c = np.zeros((n, n), np.float32)
    for s in edge_paths:
        for d in edge_paths[s]:
            p = list(edge_paths[s][d])[:L]
            if len(p) == 0:
                continue  # mean of empty -> nan -> nan_to_num -> 0
            dots = (ev[: len(p)] * ea[p]).sum(axis=1)
            c[s, d] = dots.mean()

    m_inf = np.full((n, n), -1.0e6, np.float32)
    m_zero = np.zeros((n, n), np.float32)
    if ptr is None:
        m_inf[:] = 1.0
        m_zero[:] = 1.0
    else:
        pp = [int(t) for t in ptr]
        for i in range(len(pp) - 1):
            m_inf[pp[i]:pp[i + 1], pp[i]:pp[i + 1]] = 1.0
            m_zero[pp[i]:pp[i + 1], pp[i]:pp[i + 1]] = 1.0

    a = (q @ k.T) / np.sqrt(np.float32(q.shape[-1]))
    a = (a + np.asarray(b, np.float32) + c) * m_inf
    a = a - a.max(axis=-1, keepdims=True)
    p = np.exp(a)
    p = p / p.sum(axis=-1, keepdims=True)
    p = p * m_zero
    return p @ v


# ---------------------------------------------------------------------------
if __name__ == "__main__":
    dim_in, dim_q, dim_k = 32, 32, 32
    edge_dim, max_path_distance = 8, 4
    n_nodes, n_edges = 12, 20
    ptr = [0, 5, 12]

    root = jax.random.PRNGKey(0)
    ks = jax.random.split(root, 12)
    query = jax.random.normal(ks[0], (n_nodes, dim_in), jnp.float32)
    key_x = jax.random.normal(ks[1], (n_nodes, dim_in), jnp.float32)
    value_x = jax.random.normal(ks[2], (n_nodes, dim_in), jnp.float32)
    edge_attr = jax.random.normal(ks[3], (n_edges, edge_dim), jnp.float32)
    b = 0.1 * jax.random.normal(ks[4], (n_nodes, n_nodes), jnp.float32)

    params = {
        "wq": 0.2 * jax.random.normal(ks[5], (dim_q, dim_in), jnp.float32),
        "bq": 0.1 * jax.random.normal(ks[6], (dim_q,), jnp.float32),
        "wk": 0.2 * jax.random.normal(ks[7], (dim_k, dim_in), jnp.float32),
        "bk": 0.1 * jax.random.normal(ks[8], (dim_k,), jnp.float32),
        "wv": 0.2 * jax.random.normal(ks[9], (dim_k, dim_in), jnp.float32),
        "bv": 0.1 * jax.random.normal(ks[10], (dim_k,), jnp.float32),
        "edge_vector": 0.2 * jax.random.normal(
            ks[11], (max_path_distance, edge_dim), jnp.float32),
    }

    # Deterministic toy edge paths (dict-of-dicts, as in torch_geometric usage).
    edge_paths = {}
    for s in range(n_nodes):
        edge_paths[s] = {}
        for d in range(n_nodes):
            if s != d and (s + d) % 3 == 0:
                plen = 1 + (s + 2 * d) % max_path_distance
                edge_paths[s][d] = [(s * 7 + d * 3 + t) % n_edges for t in range(plen)]

    ok = True
    for cur_ptr in (ptr, None):   # batched graphs and the ptr=None (all-ones mask) path
        out = graphormer_attention_head(query, key_x, value_x, edge_attr, b,
                                        edge_paths, cur_ptr, params)
        out = jax.block_until_ready(out)
        ref = _reference_forward(query, key_x, value_x, edge_attr, b,
                                 edge_paths, cur_ptr, params)
        assert out.shape == (n_nodes, dim_k)
        diff = float(np.max(np.abs(np.asarray(out) - ref)))
        # tolerance accounts for bf16 bias stream + approx reciprocal + MXU f32 pass
        if not np.allclose(np.asarray(out), ref, atol=5e-2, rtol=5e-2):
            ok = False
            print("mismatch (ptr=%s) max|diff|=%g" % (cur_ptr, diff))

    if ok:
        print("KERNEL_OK")
</pallas_src>

<mosaic_0001>
module attributes {stable_mosaic.version = 11 : i64} {
  func.func @_proj_kernel(%arg0: i32, %arg1: memref<16x32xf32, #tpu.memory_space<vmem>>, %arg2: memref<32x128xf32, #tpu.memory_space<vmem>>, %arg3: memref<1x128xf32, #tpu.memory_space<vmem>>, %arg4: memref<16x128xf32, #tpu.memory_space<vmem>>) attributes {dimension_semantics = [#tpu.dimension_semantics<parallel>], iteration_bounds = array<i64: 6>, scalar_prefetch = 0 : i64, scratch_operands = 0 : i64, tpu.core_type = #tpu.core_type<tc>, window_params = [{transform_indices = @transform_0, window_bounds = array<i64: 16, 32>}, {pipeline_mode = #tpu.pipeline_mode<synchronous>, transform_indices = @transform_1, window_bounds = array<i64: 32, 128>}, {pipeline_mode = #tpu.pipeline_mode<synchronous>, transform_indices = @transform_2, window_bounds = array<i64: 1, 128>}, {transform_indices = @transform_3, window_bounds = array<i64: 16, 128>}]} {
    %c0 = arith.constant 0 : index
    %c0_0 = arith.constant 0 : index
    %0 = vector.load %arg1[%c0, %c0_0] : memref<16x32xf32, #tpu.memory_space<vmem>>, vector<16x32xf32>
    %c0_1 = arith.constant 0 : index
    %c0_2 = arith.constant 0 : index
    %1 = vector.load %arg2[%c0_1, %c0_2] : memref<32x128xf32, #tpu.memory_space<vmem>>, vector<32x128xf32>
    %cst = arith.constant dense<0.000000e+00> : vector<16x128xf32>
    %2 = tpu.matmul %0, %1, %cst {dimension_numbers = #tpu.dot_dimension_numbers<[1], [0], [0], [1], [0, 0, 1, 1], [], []>} : vector<16x32xf32>, vector<32x128xf32>, vector<16x128xf32> -> vector<16x128xf32>
    %c0_3 = arith.constant 0 : index
    %c0_4 = arith.constant 0 : index
    %3 = vector.load %arg3[%c0_3, %c0_4] : memref<1x128xf32, #tpu.memory_space<vmem>>, vector<1x128xf32>
    %4 = vector.broadcast %3 : vector<1x128xf32> to vector<16x128xf32>
    %5 = arith.addf %2, %4 : vector<16x128xf32>
    %c0_5 = arith.constant 0 : index
    %c0_6 = arith.constant 0 : index
    %6 = vector.load %arg4[%c0_5, %c0_6] : memref<16x128xf32, #tpu.memory_space<vmem>>, vector<16x128xf32>
    tpu.vector_store %arg4[%c0_5, %c0_6], %5 {strides = array<i32>} : memref<16x128xf32, #tpu.memory_space<vmem>>, vector<16x128xf32>,
    return
  }
  func.func @transform_0(%arg0: i32) -> (i32, i32) {
    %c0_i32 = arith.constant 0 : i32
    %c0_i32_0 = arith.constant 0 : i32
    return %arg0, %c0_i32 : i32, i32
  }
  func.func @transform_1(%arg0: i32) -> (i32, i32) {
    %c0_i32 = arith.constant 0 : i32
    %c0_i32_0 = arith.constant 0 : i32
    %c0_i32_1 = arith.constant 0 : i32
    return %c0_i32, %c0_i32_0 : i32, i32
  }
  func.func @transform_2(%arg0: i32) -> (i32, i32) {
    %c0_i32 = arith.constant 0 : i32
    %c0_i32_0 = arith.constant 0 : i32
    %c0_i32_1 = arith.constant 0 : i32
    return %c0_i32, %c0_i32_0 : i32, i32
  }
  func.func @transform_3(%arg0: i32) -> (i32, i32) {
    %c0_i32 = arith.constant 0 : i32
    %c0_i32_0 = arith.constant 0 : i32
    return %arg0, %c0_i32 : i32, i32
  }
}

module attributes {stable_mosaic.version = 11 : i64} {
  func.func @_attn_kernel(%arg0: i32, %arg1: i32, %arg2: memref<1xi32, #tpu.memory_space<smem>>, %arg3: memref<16x32xf32, #tpu.memory_space<vmem>>, %arg4: memref<32x32xf32, #tpu.memory_space<vmem>>, %arg5: memref<32x32xf32, #tpu.memory_space<vmem>>, %arg6: memref<16x32xbf16, #tpu.memory_space<vmem>>, %arg7: memref<16x1xi32, #tpu.memory_space<vmem>>, %arg8: memref<1x32xi32, #tpu.memory_space<vmem>>, %arg9: memref<16x32xf32, #tpu.memory_space<vmem>>, %arg10: memref<16x1xf32, #tpu.memory_space<vmem>>, %arg11: memref<16x1xf32, #tpu.memory_space<vmem>>) attributes {dimension_semantics = [#tpu.dimension_semantics<parallel>, #tpu.dimension_semantics<arbitrary>], iteration_bounds = array<i64: 2, 1>, scalar_prefetch = 1 : i64, scratch_operands = 2 : i64, tpu.core_type = #tpu.core_type<tc>, window_params = [{transform_indices = @transform_0, window_bounds = array<i64: 16, 32>}, {transform_indices = @transform_1, window_bounds = array<i64: 32, 32>}, {transform_indices = @transform_2, window_bounds = array<i64: 32, 32>}, {transform_indices = @transform_3, window_bounds = array<i64: 16, 32>}, {transform_indices = @transform_4, window_bounds = array<i64: 16, 1>}, {transform_indices = @transform_5, window_bounds = array<i64: 1, 32>}, {transform_indices = @transform_6, window_bounds = array<i64: 16, 32>}]} {
    %c0_i32 = arith.constant 0 : i32
    %0 = arith.cmpi eq, %arg1, %c0_i32 : i32
    %1 = arith.extui %0 : i1 to i32
    %c0_i32_0 = arith.constant 0 : i32
    %2 = arith.cmpi ne, %1, %c0_i32_0 : i32
    scf.if %2 {
      %cst_34 = arith.constant 0xFF800000 : f32
      %57 = vector.broadcast %cst_34 : f32 to vector<16x1xf32>
      %c0_35 = arith.constant 0 : index
      %c0_36 = arith.constant 0 : index
      %58 = vector.load %arg10[%c0_35, %c0_36] : memref<16x1xf32, #tpu.memory_space<vmem>>, vector<16x1xf32>
      tpu.vector_store %arg10[%c0_35, %c0_36], %57 {strides = array<i32>} : memref<16x1xf32, #tpu.memory_space<vmem>>, vector<16x1xf32>,
      %cst_37 = arith.constant 0.000000e+00 : f32
      %59 = vector.broadcast %cst_37 : f32 to vector<16x1xf32>
      %c0_38 = arith.constant 0 : index
      %c0_39 = arith.constant 0 : index
      %60 = vector.load %arg11[%c0_38, %c0_39] : memref<16x1xf32, #tpu.memory_space<vmem>>, vector<16x1xf32>
      tpu.vector_store %arg11[%c0_38, %c0_39], %59 {strides = array<i32>} : memref<16x1xf32, #tpu.memory_space<vmem>>, vector<16x1xf32>,
      %cst_40 = arith.constant 0.000000e+00 : f32
      %61 = vector.broadcast %cst_40 : f32 to vector<16x32xf32>
      %c0_41 = arith.constant 0 : index
      %c0_42 = arith.constant 0 : index
      %62 = vector.load %arg9[%c0_41, %c0_42] : memref<16x32xf32, #tpu.memory_space<vmem>>, vector<16x32xf32>
      tpu.vector_store %arg9[%c0_41, %c0_42], %61 {strides = array<i32>} : memref<16x32xf32, #tpu.memory_space<vmem>>, vector<16x32xf32>,
    } else {
    }
    %c0 = arith.constant 0 : index
    %c0_1 = arith.constant 0 : index
    %3 = vector.load %arg3[%c0, %c0_1] : memref<16x32xf32, #tpu.memory_space<vmem>>, vector<16x32xf32>
    %c0_2 = arith.constant 0 : index
    %c0_3 = arith.constant 0 : index
    %4 = vector.load %arg4[%c0_2, %c0_3] : memref<32x32xf32, #tpu.memory_space<vmem>>, vector<32x32xf32>
    %cst = arith.constant dense<0.000000e+00> : vector<16x32xf32>
    %5 = tpu.matmul %3, %4, %cst {dimension_numbers = #tpu.dot_dimension_numbers<[1], [1], [0], [0], [0, 0, 1, 0], [], []>} : vector<16x32xf32>, vector<32x32xf32>, vector<16x32xf32> -> vector<16x32xf32>
    %c0_4 = arith.constant 0 : index
    %c0_5 = arith.constant 0 : index
    %6 = vector.load %arg6[%c0_4, %c0_5] : memref<16x32xbf16, #tpu.memory_space<vmem>>, vector<16x32xbf16>
    %7 = arith.extf %6 : vector<16x32xbf16> to vector<16x32xf32>
    %8 = arith.addf %5, %7 : vector<16x32xf32>
    %c0_6 = arith.constant 0 : index
    %c0_7 = arith.constant 0 : index
    %9 = vector.load %arg7[%c0_6, %c0_7] : memref<16x1xi32, #tpu.memory_space<vmem>>, vector<16x1xi32>
    %c0_8 = arith.constant 0 : index
    %c0_9 = arith.constant 0 : index
    %10 = vector.load %arg8[%c0_8, %c0_9] : memref<1x32xi32, #tpu.memory_space<vmem>>, vector<1x32xi32>
    %11 = vector.broadcast %9 : vector<16x1xi32> to vector<16x32xi32>
    %12 = vector.broadcast %10 : vector<1x32xi32> to vector<16x32xi32>
    %13 = arith.cmpi eq, %11, %12 : vector<16x32xi32>
    %cst_10 = arith.constant 1.000000e+00 : f32
    %cst_11 = arith.constant -1.000000e+06 : f32
    %14 = vector.broadcast %cst_10 : f32 to vector<16x32xf32>
    %15 = vector.broadcast %cst_11 : f32 to vector<16x32xf32>
    %16 = arith.select %13, %14, %15 : vector<16x32xi1>, vector<16x32xf32>
    %17 = arith.mulf %8, %16 : vector<16x32xf32>
    %c32_i32 = arith.constant 32 : i32
    %18 = arith.muli %arg1, %c32_i32 : i32
    %19 = tpu.iota {dimensions = array<i32: 1>} : vector<1x32xi32>
    %20 = vector.broadcast %18 : i32 to vector<1x32xi32>
    %21 = arith.addi %20, %19 : vector<1x32xi32>
    %c0_12 = arith.constant 0 : index
    %22 = memref.load %arg2[%c0_12] : memref<1xi32, #tpu.memory_space<smem>>
    %23 = vector.broadcast %22 : i32 to vector<1x32xi32>
    %24 = arith.cmpi slt, %21, %23 : vector<1x32xi32>
    %cst_13 = arith.constant -1.000000e+30 : f32
    %25 = vector.shape_cast %24 : vector<1x32xi1> to vector<1x32xi1>
    %26 = vector.broadcast %25 : vector<1x32xi1> to vector<16x32xi1>
    %27 = vector.broadcast %cst_13 : f32 to vector<16x32xf32>
    %28 = arith.select %26, %17, %27 : vector<16x32xi1>, vector<16x32xf32>
    %c0_14 = arith.constant 0 : index
    %c0_15 = arith.constant 0 : index
    %29 = vector.load %arg10[%c0_14, %c0_15] : memref<16x1xf32, #tpu.memory_space<vmem>>, vector<16x1xf32>
    %cst_16 = arith.constant dense<0xFF800000> : vector<16xf32>
    %30 = vector.multi_reduction <maximumf>, %28, %cst_16 [1] : vector<16x32xf32> to vector<16xf32>
    %31 = vector.shape_cast %30 : vector<16xf32> to vector<16x1xf32>
    %32 = arith.maximumf %29, %31 : vector<16x1xf32>
    %33 = arith.subf %29, %32 : vector<16x1xf32>
    %34 = math.exp %33 : vector<16x1xf32>
    %35 = vector.broadcast %32 : vector<16x1xf32> to vector<16x32xf32>
    %36 = arith.subf %28, %35 : vector<16x32xf32>
    %37 = math.exp %36 : vector<16x32xf32>
    %c0_17 = arith.constant 0 : index
    %c0_18 = arith.constant 0 : index
    %38 = vector.load %arg11[%c0_17, %c0_18] : memref<16x1xf32, #tpu.memory_space<vmem>>, vector<16x1xf32>
    %39 = arith.mulf %34, %38 : vector<16x1xf32>
    %cst_19 = arith.constant dense<0.000000e+00> : vector<16xf32>
    %40 = vector.multi_reduction <add>, %37, %cst_19 [1] : vector<16x32xf32> to vector<16xf32>
    %41 = vector.shape_cast %40 : vector<16xf32> to vector<16x1xf32>
    %42 = arith.addf %39, %41 : vector<16x1xf32>
    %c0_20 = arith.constant 0 : index
    %c0_21 = arith.constant 0 : index
    %43 = vector.load %arg11[%c0_20, %c0_21] : memref<16x1xf32, #tpu.memory_space<vmem>>, vector<16x1xf32>
    tpu.vector_store %arg11[%c0_20, %c0_21], %42 {strides = array<i32>} : memref<16x1xf32, #tpu.memory_space<vmem>>, vector<16x1xf32>,
    %cst_22 = arith.constant 0.000000e+00 : f32
    %44 = vector.broadcast %cst_22 : f32 to vector<16x32xf32>
    %45 = arith.select %13, %37, %44 : vector<16x32xi1>, vector<16x32xf32>
    %c0_23 = arith.constant 0 : index
    %c0_24 = arith.constant 0 : index
    %46 = vector.load %arg9[%c0_23, %c0_24] : memref<16x32xf32, #tpu.memory_space<vmem>>, vector<16x32xf32>
    %47 = vector.broadcast %34 : vector<16x1xf32> to vector<16x32xf32>
    %48 = arith.mulf %47, %46 : vector<16x32xf32>
    %c0_25 = arith.constant 0 : index
    %c0_26 = arith.constant 0 : index
    %49 = vector.load %arg5[%c0_25, %c0_26] : memref<32x32xf32, #tpu.memory_space<vmem>>, vector<32x32xf32>
    %cst_27 = arith.constant dense<0.000000e+00> : vector<16x32xf32>
    %50 = tpu.matmul %45, %49, %cst_27 {dimension_numbers = #tpu.dot_dimension_numbers<[1], [0], [0], [1], [0, 0, 1, 1], [], []>} : vector<16x32xf32>, vector<32x32xf32>, vector<16x32xf32> -> vector<16x32xf32>
    %51 = arith.addf %48, %50 : vector<16x32xf32>
    %c0_28 = arith.constant 0 : index
    %c0_29 = arith.constant 0 : index
    %52 = vector.load %arg9[%c0_28, %c0_29] : memref<16x32xf32, #tpu.memory_space<vmem>>, vector<16x32xf32>
    tpu.vector_store %arg9[%c0_28, %c0_29], %51 {strides = array<i32>} : memref<16x32xf32, #tpu.memory_space<vmem>>, vector<16x32xf32>,
    %c0_30 = arith.constant 0 : index
    %c0_31 = arith.constant 0 : index
    %53 = vector.load %arg10[%c0_30, %c0_31] : memref<16x1xf32, #tpu.memory_space<vmem>>, vector<16x1xf32>
    tpu.vector_store %arg10[%c0_30, %c0_31], %32 {strides = array<i32>} : memref<16x1xf32, #tpu.memory_space<vmem>>, vector<16x1xf32>,
    %c0_i32_32 = arith.constant 0 : i32
    %54 = arith.cmpi eq, %arg1, %c0_i32_32 : i32
    %55 = arith.extui %54 : i1 to i32
    %c0_i32_33 = arith.constant 0 : i32
    %56 = arith.cmpi ne, %55, %c0_i32_33 : i32
    scf.if %56 {
      %c0_34 = arith.constant 0 : index
      %c0_35 = arith.constant 0 : index
      %57 = vector.load %arg9[%c0_34, %c0_35] : memref<16x32xf32, #tpu.memory_space<vmem>>, vector<16x32xf32>
      %c0_36 = arith.constant 0 : index
      %c0_37 = arith.constant 0 : index
      %58 = vector.load %arg11[%c0_36, %c0_37] : memref<16x1xf32, #tpu.memory_space<vmem>>, vector<16x1xf32>
      %59 = tpu.reciprocal %58 {approx = true} : vector<16x1xf32> -> vector<16x1xf32>
      %60 = vector.broadcast %59 : vector<16x1xf32> to vector<16x32xf32>
      %61 = arith.mulf %57, %60 : vector<16x32xf32>
      %c0_38 = arith.constant 0 : index
      %c0_39 = arith.constant 0 : index
      %62 = vector.load %arg9[%c0_38, %c0_39] : memref<16x32xf32, #tpu.memory_space<vmem>>, vector<16x32xf32>
      tpu.vector_store %arg9[%c0_38, %c0_39], %61 {strides = array<i32>} : memref<16x32xf32, #tpu.memory_space<vmem>>, vector<16x32xf32>,
    } else {
    }
    return
  }
  func.func @transform_0(%arg0: i32, %arg1: i32, %arg2: memref<1xi32, #tpu.memory_space<smem>>) -> (i32, i32) {
    %c0_i32 = arith.constant 0 : i32
    %c0_i32_0 = arith.constant 0 : i32
    return %arg0, %c0_i32 : i32, i32
  }
  func.func @transform_1(%arg0: i32, %arg1: i32, %arg2: memref<1xi32, #tpu.memory_space<smem>>) -> (i32, i32) {
    %c0_i32 = arith.constant 0 : i32
    %c0_i32_0 = arith.constant 0 : i32
    return %arg1, %c0_i32 : i32, i32
  }
  func.func @transform_2(%arg0: i32, %arg1: i32, %arg2: memref<1xi32, #tpu.memory_space<smem>>) -> (i32, i32) {
    %c0_i32 = arith.constant 0 : i32
    %c0_i32_0 = arith.constant 0 : i32
    return %arg1, %c0_i32 : i32, i32
  }
  func.func @transform_3(%arg0: i32, %arg1: i32, %arg2: memref<1xi32, #tpu.memory_space<smem>>) -> (i32, i32) {
    %c0_i32 = arith.constant 0 : i32
    return %arg0, %arg1 : i32, i32
  }
  func.func @transform_4(%arg0: i32, %arg1: i32, %arg2: memref<1xi32, #tpu.memory_space<smem>>) -> (i32, i32) {
    %c0_i32 = arith.constant 0 : i32
    %c0_i32_0 = arith.constant 0 : i32
    return %arg0, %c0_i32 : i32, i32
  }
  func.func @transform_5(%arg0: i32, %arg1: i32, %arg2: memref<1xi32, #tpu.memory_space<smem>>) -> (i32, i32) {
    %c0_i32 = arith.constant 0 : i32
    %c0_i32_0 = arith.constant 0 : i32
    return %c0_i32, %arg1 : i32, i32
  }
  func.func @transform_6(%arg0: i32, %arg1: i32, %arg2: memref<1xi32, #tpu.memory_space<smem>>) -> (i32, i32) {
    %c0_i32 = arith.constant 0 : i32
    %c0_i32_0 = arith.constant 0 : i32
    return %arg0, %c0_i32 : i32, i32
  }
}

</mosaic_0001>

<bundles_post_ra>
// kernel: mul.9
= control target key start
LH: loop header
LB: loop body
LE: loop exit
PB: predicated region body
PF: predicated region fallthrough
CT: control target
= control target key end

     0   :  { %s34_s0 = inlined_call_operand.vmem [shape: f32[44], index: 0, kind: input, shape index: {}]   ;;  %s35_s1 = inlined_call_operand.vmem [shape: f32[44], index: 1, kind: input, shape index: {}]   ;;  %s36_s2 = inlined_call_operand.vmem [shape: f32[44], index: 2, kind: output, shape index: {}]  }
   0x1   :  { %v3_v0 = vld [vmem:[%s34_s0] sm:$0x1] }
   0x2   :  { %v4_v1 = vld [vmem:[%s35_s1] sm:$0x1] }
   0x3   :  { %v7_v2 = vmul.f32 %v4_v1, %v3_v0 }
   0x5   :  { %9 = vst [vmem:[%s36_s2] sm:$0x1] %v7_v2 }

// kernel: _forward.2
= control target key start
LH: loop header
LB: loop body
LE: loop exit
PB: predicated region body
PF: predicated region fallthrough
CT: control target
= control target key end

     0   :  { %s326_s12 = smov 0   ;;  %s358_s0 = inlined_call_operand.vmem [shape: f32[96,32], index: 0, kind: input, shape index: {}]   ;;  %s359_s1 = inlined_call_operand.vmem [shape: f32[32,128], index: 1, kind: input, shape index: {}]   ;;  %s360_s2 = inlined_call_operand.vmem [shape: f32[1,128], index: 2, kind: input, shape index: {}]   ;;  %s361_s3 = inlined_call_operand.vmem [shape: f32[96,128], index: 3, kind: output, shape index: {}]  }
   0x1 LB: > { %s272_s13 = sadd.s32 4294967295, %s304_s12   ;;  %p276_p0 = scmp.ge.s32.totalorder %s304_s12, 1  ;;  %s304_s12 = sphi %s326_s12, %s13_s12  }
   0x2   : > { %p138_p1 = scmp.lt.s32.totalorder %s304_s12, 7 }
   0x4   : > { %p139_p2 = pnand %p276_p0, %p138_p1 }
   0x5   : > { %s277_s18 = sshll.u32 (!%p139_p2), %s272_s13, 1 }
   0x6   : > { %142 = sbr.rel (%p139_p2) target bundleno = 149 (0x95), region = 32  ;;  %p163_p3 = scmp.lt.s32.totalorder (!%p139_p2), %s277_s18, 11 }
   0xb   : > { %v179_v0 = vld [vmem:[%s359_s1 + $0x18] sm:$0xff]  ;;  %v178_v1 = vld [vmem:[%s359_s1 + $0x10] sm:$0xff]  ;;  %v177_v2 = vld [vmem:[%s359_s1 + $0x8] sm:$0xff]  ;;  %s363_s18 = smov (!%p163_p3, %s277_s18), 11  ;;  %vm184_vm0 = vcmask 261120  }
   0xc   : > { %203 = vmatpush.msra.mxu0 %v179_v0  ;;  %285 = vmatpush.msra.mxu1 %v179_v0  ;;  %v176_v3 = vld [vmem:[%s359_s1] sm:$0xff]  ;;  %s278_s23 = sshll.u32 %s363_s18, 3 }
   0xd   : > { %s166_s26 = scalar_lea.vmem %s358_s0, %s278_s23  ;;  %v297_v6 = vld [vmem:[%s360_s2] ss:$0 sm:$0xff]  ;;  %s172_s4 = scalar_lea.vmem %s361_s3, %s278_s23 }
   0xe   : > { %204 = vmatpush.msra.mxu0 %v178_v1  ;;  %286 = vmatpush.msra.mxu1 %v178_v1  ;;  %v174_v4 = vld [vmem:[%s166_s26] sm:$0xff]  ;;  %v175_v5 = vld [vmem:[%s166_s26 + $0x8] sm:$0xff] }
  0x10   : > { %205 = vmatpush.msra.mxu0 %v177_v2  ;;  %287 = vmatpush.msra.mxu1 %v177_v2 }
  0x12   : > { %206 = vmatpush.msra.mxu0 %v176_v3  ;;  %288 = vmatpush.msra.mxu1 %v176_v3 }
  0x13   : > { %281 = vmatmul.msk.f32.vlgmr.msra.gmra.mxu0 %vm184_vm0, %v174_v4  ;;  %282 = vmatmul.msk.f32.vlgmr.msra.gmra.mxu1 %vm184_vm0, %v175_v5 }
  0x90   : > { %v208_v7 = vpop.f32.mrf.mxu0  ;;  %v211_v8 = vpop.f32.mrf.mxu1 }
  0x91   : > { %v209_v9 = vadd.f32 %v297_v6, %v208_v7  ;;  %v212_v10 = vadd.f32 %v297_v6, %v211_v8 }
  0x93   : > { %214 = vst [vmem:[%s172_s4] sm:$0xff] %v209_v9 }
  0x94   : > { %215 = vst [vmem:[%s172_s4 + $0x8] sm:$0xff] %v212_v10 }
  0x95 PF: > { %s13_s12 = sadd.s32 1, %s304_s12  }
  0x96   : > { %p10_p4 = scmp.ge.s32.totalorder %s13_s12, 8  }
  0x98   :  { %12 = sbr.rel (!%p10_p4) target bundleno = 1 (0x1), region = 62 }

// kernel: _forward.3
= control target key start
LH: loop header
LB: loop body
LE: loop exit
PB: predicated region body
PF: predicated region fallthrough
CT: control target
= control target key end

     0   :  { %s1188_s0 = inlined_call_operand.<no memory space> [shape: s32[1], index: 0, kind: input, shape index: {}]   ;;  %s1189_s1 = inlined_call_operand.vmem [shape: f32[32,32], index: 1, kind: input, shape index: {}]   ;;  %s1190_s2 = inlined_call_operand.vmem [shape: f32[32,32], index: 2, kind: input, shape index: {}]   ;;  %s1191_s3 = inlined_call_operand.vmem [shape: f32[32,32], index: 3, kind: input, shape index: {}]   ;;  %s1192_s4 = inlined_call_operand.vmem [shape: bf16[32,32], index: 4, kind: input, shape index: {}]   ;;  %s1193_s5 = inlined_call_operand.vmem [shape: s32[32,1], index: 5, kind: input, shape index: {}]   ;;  %s1194_s6 = inlined_call_operand.vmem [shape: s32[1,32], index: 6, kind: input, shape index: {}]   ;;  %s1195_s7 = inlined_call_operand.hbm [shape: f32[32,32], index: 7, kind: output, shape index: {}]  }
   0x1   :  { %12 = sst [smem:[#allocation5]] %s1188_s0 }
   0x2   :  { %13 = vsyncpa [#allocation7], 0 }
   0x3   :  { %15 = vsyncpa [#allocation7 + $0x1], 0  ;;  %s995_s26 = smov 0   ;;  %s997_s27 = smov 0  }
   0x4   :  { %s999_s28 = smov 0   ;;  %s1001_s29 = smov 0  }
   0x5   :  { %s1003_s30 = smov 0   ;;  %s1005_s8 = smov 0  }
   0x6 LB: > { %s752_s0 = sadd.s32 4294967295, %s944_s8   ;;  %s753_s9 = sadd.s32 4294967294, %s944_s8   ;;  %s944_s8 = sphi %s1005_s8, %s21_s8   ;;  %s940_s30 = sphi %s1003_s30, %s1202_s30   ;;  %s936_s29 = sphi %s1001_s29, %s1201_s29   ;;  %s932_s28 = sphi %s999_s28, %s1200_s28   ;;  %s928_s27 = sphi %s997_s27, %s1199_s27   ;;  %s924_s26 = sphi %s995_s26, %s1198_s26  }
   0x7   : > { %s33_s10 = sadd.s32 1, %s940_s30  ;;  %s198_s11 = sadd.s32 1, %s932_s28 }
   0x8   : > { %p35_p0 = scmp.ge.s32.totalorder %s33_s10, 2  ;;  %p208_p1 = scmp.ne.s32.totalorder %s932_s28, %s928_s27 }
   0x9   : > { %p209_p2 = scmp.eq.s32.totalorder %s752_s0, 1  ;;  %p214_p3 = scmp.ne.s32.totalorder %s928_s27, %s924_s26 }
   0xa   : > { %s1204_s10 = smov (%p35_p0, %s33_s10), 0  ;;  %p215_p5 = scmp.eq.s32.totalorder %s753_s9, 1 }
   0xb   : > { %p1035_p4 = por %p209_p2, %p208_p1  ;;  %s195_s13 = ssub.s32 %s940_s30, %s1204_s10 }
   0xc   : > { %p759_p6 = scmp.ge.s32.totalorder %s944_s8, 1  ;;  %p196_p7 = scmp.eq.s32.totalorder %s195_s13, 0 }
   0xd   : > { %p1042_p8 = por %p215_p5, %p214_p3  ;;  %p287_p9 = scmp.lt.s32.totalorder %s944_s8, 3 }
   0xe   : > { %s1048_s15 = scalar_select %p196_p7, %s932_s28, %s198_s11  }
   0xf   : > { %p288_p10 = pnand %p759_p6, %p287_p9 }
  0x10   : > { %s761_s18 = sshll.u32 (!%p288_p10), %s936_s29, 1  ;;  %s465_s23 = sld [smem:[#allocation5]] (!%p288_p10) }
  0x11   : > { %291 = sbr.rel (%p288_p10) target bundleno = 629 (0x275), region = 44  ;;  %p344_p11 = scmp.lt.s32.totalorder (!%p288_p10), %s761_s18, 3 }
  0x16   : > { %vm389_vm0 = vcmask 261120   ;;  %v397_v0 = vld [vmem:[%s1190_s2 + $0x18] sm:$0xff]  ;;  %v396_v1 = vld [vmem:[%s1190_s2 + $0x10] sm:$0xff]  ;;  %v946_v2 = vmov 0   ;;  %s1206_s18 = smov (!%p344_p11, %s761_s18), 3  ;;  %v395_v3 = vld [vmem:[%s1190_s2 + $0x8] sm:$0xff]  ;;  %v461_v13 = vlaneseq  ;;  %v466_v16 = vstv %s465_s23 }
  0x17   : > { %767 = vmatpush.xpose.msk.msra.mxu0 %vm389_vm0, %v397_v0  ;;  %785 = vmatpush.xpose.msk.msra.mxu2 %vm389_vm0, %v397_v0  ;;  %s762_s21 = sshll.u32 %s1206_s18, 3  ;;  %v394_v5 = vld [vmem:[%s1190_s2] sm:$0xff]  ;;  %vm384_vm1 = vcmask 7168   ;;  %v947_v9 = vmov -inf   ;;  %s764_s19 = sshll.u32 %s1206_s18, 2  ;;  %v949_v32 = vmov 0.0  }
  0x18   : > { %850 = vset.pattern.permute.xlu0 %v946_v2  ;;  %851 = vset.pattern.permute.xlu2 %v946_v2  ;;  %s374_s0 = scalar_lea.vmem %s1193_s5, %s762_s21  ;;  %s347_s17 = scalar_lea.vmem %s1189_s1, %s762_s21  ;;  %385 = vst.msk [vmem:[#allocation2] sm:$0xff] %vm384_vm1, %v947_v9  ;;  %v1089_v11 = vld [vmem:[%s1194_s6] ss:$0 sm:$0xff]  ;;  %v462_v15 = vand.u32 127, %v461_v13  ;;  %v948_v17 = vmov -1000000.0  }
  0x19   : > { %852 = vset.pattern.permute.xlu1 %v946_v2  ;;  %v444_v4 = vld [vmem:[%s374_s0] sm:$0xff]  ;;  %v393_v7 = vld [vmem:[%s347_s17 + $0x8] sm:$0xff]  ;;  %386 = vst.msk [vmem:[#allocation2 + $0x8] sm:$0xff] %vm384_vm1, %v947_v9  ;;  %s368_s22 = scalar_lea.vmem %s1192_s4, %s764_s19  ;;  %s340_s18 = sand.u32 1, %s928_s27   ;;  %v538_v43 = vld [vmem:[%s1191_s3 + $0x18] sm:$0xff] }
  0x1a   : > { %448 = vperm.xlu0 %850, %v444_v4   ;;  %v392_v6 = vld [vmem:[%s347_s17] sm:$0xff]  ;;  %v445_v8 = vld [vmem:[%s374_s0 + $0x8] sm:$0xff]  ;;  %vm467_vm3 = vcmp.lt.s32.totalorder %v462_v15, %v466_v16  ;;  %s760_s0 = sshll.u32 %s340_s18, 4  ;;  %387 = vst.msk [vmem:[#allocation3] sm:$0xff] %vm384_vm1, %v949_v32  ;;  %v537_v44 = vld [vmem:[%s1191_s3 + $0x10] sm:$0xff]  ;;  %557 = vmatpush.msra.mxu1 %v538_v43  ;;  %s780_s23 = sshll.u32 %s936_s29, 4 }
  0x1b   : > { %768 = vmatpush.xpose.msk.msra.mxu0 %vm389_vm0, %v396_v1  ;;  %786 = vmatpush.xpose.msk.msra.mxu2 %vm389_vm0, %v396_v1  ;;  %v782_v12 = vld [vmem:[%s368_s22] sm:$0xff]   ;;  %s1104_s9 = scalar_lea.vmem [#allocation6], %s760_s0  ;;  %388 = vst.msk [vmem:[#allocation3 + $0x8] sm:$0xff] %vm384_vm1, %v949_v32  ;;  %v536_v45 = vld [vmem:[%s1191_s3 + $0x8] sm:$0xff]  ;;  %s609_s0 = scalar_lea.hbm %s1195_s7, %s780_s23 }
  0x1c   : > { %v783_v14 = vunpack.c.l.bf16 %v782_v12  ;;  %v784_v23 = vunpack.c.h.bf16 %v782_v12  ;;  %390 = vst.msk [vmem:[%s1104_s9] sm:$0xff] %vm389_vm0, %v949_v32  ;;  %558 = vmatpush.msra.mxu1 %v537_v44  ;;  %v535_v46 = vld [vmem:[%s1191_s3] sm:$0xff]  ;;  %s610_s11 = sshll.u32 %s1104_s9, 4  ;;  %s612_s13 = sshll.u32 %s609_s0, 4  ;;  %s611_s11 = int_to_ptr.vmem [resolvable:$true] %s610_s11  ;;  %s613_s13 = int_to_ptr.hbm [resolvable:$true] %s612_s13 }
  0x1d   : > { %391 = vst.msk [vmem:[%s1104_s9 + $0x8] sm:$0xff] %vm389_vm0, %v949_v32  ;;  %s598_s29 = scalar_lea.sflag [#allocation7], %s340_s18  ;;  %s880_s16 = sshra.s32 %s613_s13, 4  ;;  %s881_s16 = int_to_ptr.hbm [resolvable:$true] %s880_s16 }
  0x1e   : > { %559 = vmatpush.msra.mxu1 %v536_v45  ;;  %s882_s17 = scalar_lea.hbm %s881_s16, 16  ;;  %s886_s21 = scalar_lea.hbm %s1195_s7, 32 }
  0x1f   : > { %769 = vmatpush.xpose.msk.msra.mxu0 %vm389_vm0, %v395_v3  ;;  %787 = vmatpush.xpose.msk.msra.mxu2 %vm389_vm0, %v395_v3  ;;  %v472_v33 = vld [vmem:[#allocation2] sm:$0xff]  ;;  %p883_p12 = scmp.ne.s32.totalorder %s881_s16, %s882_s17  ;;  %p887_p1 = scmp.lt.s32.totalorder %s881_s16, %s1195_s7 }
  0x20   : > { %v473_v37 = vld [vmem:[#allocation2 + $0x8] sm:$0xff]  ;;  %560 = vmatpush.msra.mxu1 %v535_v46  ;;  %p888_p2 = scmp.lt.s32.totalorder %s886_s21, %s882_s17 }
  0x21   : > { %v504_v61 = vld [vmem:[#allocation3] sm:$0xff]  ;;  %p884_p13 = pnand %p883_p12, %p1035_p4 }
  0x22   : > { %451 = vperm.xlu0 %850, %v445_v8   ;;  %v505_v1 = vld [vmem:[#allocation3 + $0x8] sm:$0xff]  ;;  %p889_p3 = por %p888_p2, %p887_p1 }
  0x23   : > { %770 = vmatpush.xpose.msk.msra.mxu0 %vm389_vm0, %v394_v5  ;;  %788 = vmatpush.xpose.msk.msra.mxu2 %vm389_vm0, %v394_v5  ;;  %v521_v3 = vld [vmem:[%s1104_s9] sm:$0xff]  ;;  %p885_p0 = pneg %p884_p13 }
  0x25   : > { %p890_p5 = pnand %p889_p3, %p885_p0 }
  0x26   : > { %771 = vmatmul.msk.f32.vlgmr.msra.gmra.mxu0 %vm389_vm0, %v392_v6  ;;  %772 = vmatmul.msk.f32.vlgmr.msra.gmra.mxu2 %vm389_vm0, %v393_v7 }
  0x8c   : > { %v1084_v10 = vpop.permute.xlu0 %448 }
  0x8d   : > { %vm454_vm2 = vcmp.eq.s32.totalorder %v1084_v10, %v1089_v11 }
  0x8e   : > { %v456_v18 = vsel %vm454_vm2, 1.0, %v948_v17 }
  0x94   : > { %v452_v21 = vpop.permute.xlu0 %451 }
  0x95   : > { %vm455_vm4 = vcmp.eq.s32.totalorder %v452_v21, %v1089_v11 }
  0x96   : > { %v457_v28 = vsel %vm455_vm4, 1.0, %v948_v17 }
  0xa3   : > { %v438_v19 = vpop.f32.mrf.mxu0 }
  0xa4   : > { %v439_v20 = vadd.f32 %v783_v14, %v438_v19  ;;  %v522_v14 = vld [vmem:[%s1104_s9 + $0x8] sm:$0xff] }
  0xa6   : > { %v458_v22 = vmul.f32 %v456_v18, %v439_v20 }
  0xa8   : > { %v470_v24 = vsel %vm467_vm3, %v458_v22, -1e+30 }
  0xa9   : > { %v441_v25 = vpop.f32.mrf.mxu2  ;;  %v474_v26 = vsel %vm389_vm0, %v470_v24, -inf }
  0xaa   : > { %v442_v27 = vadd.f32 %v784_v23, %v441_v25  ;;  %475 = vmax.xlane.f32.xlu1 %v474_v26 }
  0xac   : > { %v459_v29 = vmul.f32 %v457_v28, %v442_v27 }
  0xae   : > { %v471_v30 = vsel %vm467_vm3, %v459_v29, -1e+30 }
  0xaf   : > { %v477_v31 = vsel %vm389_vm0, %v471_v30, -inf }
  0xb2   : > { %478 = vmax.xlane.f32.xlu1 %v477_v31 }
 0x11d   : > { %v476_v34 = vpop.xlane.xlu1 %475 }
 0x11e   : > { %v480_v35 = vmax.f32 %v472_v33, %v476_v34 }
 0x120   : > { %572 = vst.msk [vmem:[#allocation2] sm:$0xff] %vm384_vm1, %v480_v35  ;;  %490 = vperm.xlu2 %851, %v480_v35   ;;  %v482_v36 = vsub.f32 %v472_v33, %v480_v35 }
 0x122   : > { %v484_v38 = vmul.f32 1.442695, %v482_v36 }
 0x124   : > { %854 = vpow2.f32 %v484_v38 }
 0x125   : > { %v479_v39 = vpop.xlane.xlu1 %478 }
 0x126   : > { %v481_v40 = vmax.f32 %v473_v37, %v479_v39 }
 0x128   : > { %v483_v41 = vsub.f32 %v473_v37, %v481_v40  ;;  %573 = vst.msk [vmem:[#allocation2 + $0x8] sm:$0xff] %vm384_vm1, %v481_v40  ;;  %495 = vperm.xlu2 %851, %v481_v40  }
 0x12a   : > { %v855_v42 = vpop.eup %854  ;;  %v486_v59 = vmul.f32 1.442695, %v483_v41 }
 0x12b   : > { %v506_v62 = vmul.f32 %v855_v42, %v504_v61 }
 0x130   : > { %525 = vperm.xlu2 %851, %v855_v42  }
 0x17a   : > { %v491_v47 = vpop.permute.xlu2 %490 }
 0x17b   : > { %v498_v48 = vsub.f32 %v470_v24, %v491_v47 }
 0x17d   : > { %v500_v49 = vmul.f32 1.442695, %v498_v48 }
 0x17f   : > { %856 = vpow2.f32 %v500_v49 }
 0x182   : > { %v496_v50 = vpop.permute.xlu2 %495 }
 0x183   : > { %v499_v51 = vsub.f32 %v471_v30, %v496_v50 }
 0x185   : > { %v857_v52 = vpop.eup %856  ;;  %v502_v53 = vmul.f32 1.442695, %v499_v51 }
 0x186   : > { %v519_v54 = vsel %vm454_vm2, %v857_v52, 0.0  ;;  %v508_v55 = vsel %vm389_vm0, %v857_v52, 0.0 }
 0x187   : > { %858 = vpow2.f32 %v502_v53  ;;  %773 = vmatmul.msk.f32.vlgmr.msra.gmra.mxu1 %vm389_vm0, %v519_v54  ;;  %509 = vadd.xlane.f32.xlu0 %v508_v55 }
 0x188   : > { %860 = vpow2.f32 %v486_v59 }
 0x18a   : > { %v526_v2 = vpop.permute.xlu2 %525 }
 0x18b   : > { %v533_v6 = vmul.f32 %v526_v2, %v521_v3 }
 0x18d   : > { %v859_v56 = vpop.eup %858 }
 0x18e   : > { %v520_v57 = vsel %vm455_vm4, %v859_v56, 0.0  ;;  %v511_v58 = vsel %vm389_vm0, %v859_v56, 0.0  ;;  %v861_v60 = vpop.eup %860 }
 0x18f   : > { %774 = vmatmul.msk.f32.gmra.mxu1 %vm389_vm0, %v520_v57  ;;  %512 = vadd.xlane.f32.xlu1 %v511_v58  ;;  %v507_v4 = vmul.f32 %v861_v60, %v505_v1 }
 0x1a8   : > { %530 = vperm.xlu1 %852, %v861_v60  }
 0x1fa   : > { %v510_v63 = vpop.xlane.xlu0 %509 }
 0x1fb   : > { %v514_v0 = vadd.f32 %v510_v63, %v506_v62 }
 0x1fd   : > { %517 = vst.msk [vmem:[#allocation3] sm:$0xff] %vm384_vm1, %v514_v0 }
 0x202   : > { %v513_v5 = vpop.xlane.xlu1 %512 }
 0x203   : > { %v515_v7 = vadd.f32 %v513_v5, %v507_v4 }
 0x204   : > { %v562_v8 = vpop.f32.mrf.mxu1  ;;  %v579_v9 = vld [vmem:[#allocation3] sm:$0xff] }
 0x205   : > { %518 = vst.msk [vmem:[#allocation3 + $0x8] sm:$0xff] %vm384_vm1, %v515_v7  ;;  %v568_v10 = vadd.f32 %v562_v8, %v533_v6  ;;  %862 = vrcp.f32 %v579_v9 }
 0x207   : > { %570 = vst.msk [vmem:[%s1104_s9] sm:$0xff] %vm389_vm0, %v568_v10 }
 0x20b   : > { %v863_v11 = vpop.eup %862 }
 0x20c   : > { %585 = vperm.xlu2 %851, %v863_v11   ;;  %v580_v12 = vld [vmem:[#allocation3 + $0x8] sm:$0xff]  ;;  %v565_v17 = vpop.f32.mrf.mxu1 }
 0x20d   : > { %864 = vrcp.f32 %v580_v12 }
 0x20e   : > { %v577_v20 = vld [vmem:[%s1104_s9] sm:$0xff] }
 0x213   : > { %v865_v13 = vpop.eup %864 }
 0x214   : > { %590 = vperm.xlu2 %851, %v865_v13  }
 0x21a   : > { %v531_v15 = vpop.permute.xlu1 %530 }
 0x21b   : > { %v534_v16 = vmul.f32 %v531_v15, %v522_v14 }
 0x21d   : > { %v569_v18 = vadd.f32 %v565_v17, %v534_v16 }
 0x21f   : > { %571 = vst.msk [vmem:[%s1104_s9 + $0x8] sm:$0xff] %vm389_vm0, %v569_v18 }
 0x226   : > { %v578_v23 = vld [vmem:[%s1104_s9 + $0x8] sm:$0xff] }
 0x266   : > { %v586_v19 = vpop.permute.xlu2 %585 }
 0x267   : > { %v593_v21 = vmul.f32 %v586_v19, %v577_v20 }
 0x269   : > { %595 = vst.msk [vmem:[%s1104_s9] sm:$0xff] %vm389_vm0, %v593_v21 }
 0x26e   : > { %v591_v22 = vpop.permute.xlu2 %590 }
 0x26f   : > { %v594_v24 = vmul.f32 %v591_v22, %v578_v23 }
 0x271   : > { %596 = vst.msk [vmem:[%s1104_s9 + $0x8] sm:$0xff] %vm389_vm0, %v594_v24 }
 0x272   : > { %893 = shalt.err (!%p890_p5)
}
 0x273   : > { %s950_s18 = smov 128   ;;  %s951_s9 = smov 8  }
 0x274   : > { %789 = dma.vmem_to_hbm [thread:$0]  (%p1035_p4), %s611_s11, 256, %s613_s13, %s598_s29, %s950_s18, %s950_s18, %s951_s9  }
 0x275 PF: > { %p795_p6 = scmp.ge.s32.totalorder %s944_s8, 2  ;;  %s627_s24 = sand.u32 1, %s924_s26  }
 0x276   : > { %s628_s25 = scalar_lea.sflag [#allocation7], %s627_s24 }
 0x277   : > { %p792_p7 = pnand %p795_p6, %p1042_p8 }
 0x279   : > { %p793_p9 = pneg %p792_p7 }
 0x27b   : > { %919 = dma.done.wait (%p793_p9), %s628_s25, 256  }
 0x27c   : > { %921 = vsyncadd (%p793_p9), %s628_s25, 4294967040  ;;  %s21_s8 = sadd.s32 1, %s944_s8   ;;  %s1198_s26 = smov %s928_s27 }
 0x27d   : > { %p18_p10 = scmp.ge.s32.totalorder %s21_s8, 4   ;;  %s1199_s27 = smov %s932_s28 }
 0x27e   : > { %s1200_s28 = smov %s1048_s15  ;;  %s1201_s29 = smov %s940_s30 }
 0x27f   : > { %s1202_s30 = smov %s1204_s10  ;;  %20 = sbr.rel (!%p18_p10) target bundleno = 6 (0x6), region = 102 }
 0x284   :  { %634 = vsyncpa [#allocation7], 1 }
 0x285   :  { %636 = vsyncpa [#allocation7 + $0x1], 1 }

</bundles_post_ra>
